<compile_context>
chip_gen: v6e
topology: v6e:2x2x1
jax: 0.10.0
libtpu: 0.0.40
codegen_flags: <defaults>
</compile_context>

<pallas_src>
import functools
import math

import jax
import jax.numpy as jnp
from jax.experimental import pallas as pl
from jax.experimental.pallas import tpu as pltpu  # noqa: F401  (TPU backend)

# ---- model hyper-parameters (small, synthetic) -------------------------------
D_MODEL = 32
NHEAD = 4
HEAD_DIM = D_MODEL // NHEAD
SEQ = 8
BATCH = 2
LN_EPS = 1e-5


def san_kernel(x_ref, wqkv_ref, bqkv_ref, wo_ref, obg_ref, o_ref,
               *, n_batch, nhead):
    """Whole problem in one shot.

    x_ref    : (R, E)   tokens, rows interleaved as (seq, batch) -> batch = row % n_batch
    wqkv_ref : (E, 3E)  [Wq^T | Wk^T | Wv^T], 1/sqrt(hd) folded into the Q slab
    bqkv_ref : (1, 3E)  [bq | bk | bv], bq pre-scaled
    wo_ref   : (E, E)   Wo^T
    obg_ref  : (3, E)   rows = [out_proj_bias ; ln_gamma ; ln_beta]
    """
    R, E = x_ref.shape
    H = nhead
    hd = E // H

    x = x_ref[...]                                                   # (R, E) f32

    # --- fused Q/K/V in-projection: one (R,E)@(E,3E) MXU pass + bias ----------
    qkv = jnp.dot(x, wqkv_ref[...],
                  preferred_element_type=jnp.float32) + bqkv_ref[...]   # (R, 3E)

    # --- per-head split: static slices + reshape/transpose ---------------------
    def heads(t):                                                    # (R,E)->(H,R,hd)
        return jnp.transpose(t.reshape(R, H, hd), (1, 0, 2))

    q = heads(qkv[:, :E])            # scale already folded in
    k = heads(qkv[:, E:2 * E])
    v = heads(qkv[:, 2 * E:])

    # --- scores + in-kernel cross-batch mask + softmax --------------------------
    s = jnp.einsum('hqd,hkd->hqk', q, k,
                   preferred_element_type=jnp.float32)               # (H, R, R)

    rows = jax.lax.broadcasted_iota(jnp.int32, (R, R), 0)
    cols = jax.lax.broadcasted_iota(jnp.int32, (R, R), 1)
    same_batch = (rows % n_batch) == (cols % n_batch)
    mask = jnp.where(same_batch, 0.0, -1e30).astype(jnp.float32)     # (R, R)
    s = s + mask[None]

    m = jnp.max(s, axis=-1, keepdims=True)
    p = jnp.exp(s - m)
    p = p / jnp.sum(p, axis=-1, keepdims=True)   # exact divide (EUP not a bottleneck)

    o_h = jnp.einsum('hqk,hkd->hqd', p, v,
                     preferred_element_type=jnp.float32)             # (H, R, hd)

    # --- head merge + output projection: one (R,E)@(E,E) matmul ----------------
    attn = jnp.transpose(o_h, (1, 0, 2)).reshape(R, E)               # concat heads
    obg = obg_ref[...]                                               # (3, E)
    src2 = jnp.dot(attn, wo_ref[...],
                   preferred_element_type=jnp.float32) + obg[0:1]    # (R, E)

    # --- residual (dropout = identity, eval mode) + LayerNorm -------------------
    y = x + src2
    mean = jnp.mean(y, axis=-1, keepdims=True)
    yc = y - mean
    var = jnp.mean(yc * yc, axis=-1, keepdims=True)
    y_hat = yc * jax.lax.rsqrt(var + LN_EPS)
    o_ref[...] = y_hat * obg[1:2] + obg[2:3]


def san_forward(src, params):
    """src: (L, N, E) float32, matching PyTorch nn.MultiheadAttention layout."""
    L, N, E = src.shape
    H, hd = NHEAD, HEAD_DIM
    R = L * N

    # free reshape (no transpose): rows interleaved as (l, n); batch = row % N
    x2 = src.reshape(R, E)

    # --- wrapper-side weight packing (trace-time constants) --------------------
    wi, bi = params["in_proj_weight"], params["in_proj_bias"]        # (3E,E), (3E,)
    scale = 1.0 / math.sqrt(hd)

    w_qkv = wi.T                                                     # (E, 3E)
    w_qkv = jnp.concatenate([w_qkv[:, :E] * scale, w_qkv[:, E:]], axis=1)
    b_qkv = jnp.concatenate([bi[:E] * scale, bi[E:]]).reshape(1, 3 * E)

    wo_t = params["out_proj_weight"].T                               # (E, E) = Wo^T
    obg = jnp.stack([params["out_proj_bias"],
                     params["ln_weight"],
                     params["ln_bias"]], axis=0)                     # (3, E)

    kernel = functools.partial(san_kernel, n_batch=N, nhead=H)

    out2d = pl.pallas_call(
        kernel,
        out_shape=jax.ShapeDtypeStruct((R, E), jnp.float32),
    )(x2, w_qkv, b_qkv, wo_t, obg)

    return out2d.reshape(L, N, E)      # free reshape back to (L, N, E)


def san_reference(src, params):
    """Pure-JAX reference of the same forward (eval-mode dropout)."""
    L, N, E = src.shape
    wi, bi = params["in_proj_weight"], params["in_proj_bias"]
    wo, bo = params["out_proj_weight"], params["out_proj_bias"]

    x = jnp.transpose(src, (1, 0, 2))              # (N, L, E)
    qkv = jnp.einsum("nle,fe->nlf", x, wi) + bi    # (N, L, 3E)
    q, k, v = jnp.split(qkv, 3, axis=-1)

    def split_heads(t):                            # (N, L, E) -> (N, H, L, hd)
        return jnp.transpose(t.reshape(N, L, NHEAD, HEAD_DIM), (0, 2, 1, 3))

    qh, kh, vh = split_heads(q), split_heads(k), split_heads(v)
    scores = jnp.einsum("nhqd,nhkd->nhqk", qh, kh) / math.sqrt(HEAD_DIM)
    p = jax.nn.softmax(scores, axis=-1)
    oh = jnp.einsum("nhqk,nhkd->nhqd", p, vh)      # (N, H, L, hd)
    attn = jnp.transpose(oh, (0, 2, 1, 3)).reshape(N, L, E)
    src2 = jnp.einsum("nle,fe->nlf", attn, wo) + bo

    y = x + src2
    mean = jnp.mean(y, axis=-1, keepdims=True)
    var = jnp.mean((y - mean) ** 2, axis=-1, keepdims=True)
    y = (y - mean) / jnp.sqrt(var + LN_EPS)
    y = y * params["ln_weight"] + params["ln_bias"]
    return jnp.transpose(y, (1, 0, 2))             # (L, N, E)


def init_params(key):
    k1, k2, k3, k4 = jax.random.split(key, 4)
    scale = 0.1
    return {
        "in_proj_weight": scale * jax.random.normal(k1, (3 * D_MODEL, D_MODEL), jnp.float32),
        "in_proj_bias": scale * jax.random.normal(k2, (3 * D_MODEL,), jnp.float32),
        "out_proj_weight": scale * jax.random.normal(k3, (D_MODEL, D_MODEL), jnp.float32),
        "out_proj_bias": scale * jax.random.normal(k4, (D_MODEL,), jnp.float32),
        "ln_weight": jnp.ones((D_MODEL,), jnp.float32),   # PyTorch LayerNorm default
        "ln_bias": jnp.zeros((D_MODEL,), jnp.float32),
    }


if __name__ == "__main__":
    key = jax.random.PRNGKey(0)
    k_src, k_par = jax.random.split(key)
    src = jax.random.normal(k_src, (SEQ, BATCH, D_MODEL), jnp.float32)  # (L, N, E)
    params = init_params(k_par)

    out = jax.block_until_ready(san_forward(src, params))
    ref = san_reference(src, params)

    assert out.shape == (SEQ, BATCH, D_MODEL)
    assert jnp.allclose(out, ref, atol=1e-4, rtol=1e-4), "mismatch vs JAX reference"

    print("KERNEL_OK")
</pallas_src>

<mosaic_0001>
module attributes {stable_mosaic.version = 11 : i64} {
  func.func @san_kernel(%arg0: memref<16x32xf32, #tpu.memory_space<vmem>>, %arg1: memref<32x96xf32, #tpu.memory_space<vmem>>, %arg2: memref<1x96xf32, #tpu.memory_space<vmem>>, %arg3: memref<32x32xf32, #tpu.memory_space<vmem>>, %arg4: memref<3x32xf32, #tpu.memory_space<vmem>>, %arg5: memref<16x32xf32, #tpu.memory_space<vmem>>) attributes {dimension_semantics = [], scalar_prefetch = 0 : i64, scratch_operands = 0 : i64, tpu.core_type = #tpu.core_type<tc>} {
    %c0 = arith.constant 0 : index
    %c0_0 = arith.constant 0 : index
    %0 = vector.load %arg0[%c0, %c0_0] : memref<16x32xf32, #tpu.memory_space<vmem>>, vector<16x32xf32>
    %c0_1 = arith.constant 0 : index
    %c0_2 = arith.constant 0 : index
    %1 = vector.load %arg1[%c0_1, %c0_2] : memref<32x96xf32, #tpu.memory_space<vmem>>, vector<32x96xf32>
    %cst = arith.constant dense<0.000000e+00> : vector<16x96xf32>
    %2 = tpu.matmul %0, %1, %cst {dimension_numbers = #tpu.dot_dimension_numbers<[1], [0], [0], [1], [0, 0, 1, 1], [], []>} : vector<16x32xf32>, vector<32x96xf32>, vector<16x96xf32> -> vector<16x96xf32>
    %c0_3 = arith.constant 0 : index
    %c0_4 = arith.constant 0 : index
    %3 = vector.load %arg2[%c0_3, %c0_4] : memref<1x96xf32, #tpu.memory_space<vmem>>, vector<1x96xf32>
    %4 = vector.broadcast %3 : vector<1x96xf32> to vector<16x96xf32>
    %5 = arith.addf %2, %4 : vector<16x96xf32>
    %6 = vector.extract_strided_slice %5 {offsets = [0, 0], sizes = [16, 32], strides = [1, 1]} : vector<16x96xf32> to vector<16x32xf32>
    %7 = vector.shape_cast %6 : vector<16x32xf32> to vector<16x4x8xf32>
    %8 = tpu.transpose %7, [1, 0, 2] : vector<16x4x8xf32> -> vector<4x16x8xf32>
    %9 = vector.extract_strided_slice %5 {offsets = [0, 32], sizes = [16, 32], strides = [1, 1]} : vector<16x96xf32> to vector<16x32xf32>
    %10 = vector.shape_cast %9 : vector<16x32xf32> to vector<16x4x8xf32>
    %11 = tpu.transpose %10, [1, 0, 2] : vector<16x4x8xf32> -> vector<4x16x8xf32>
    %12 = vector.extract_strided_slice %5 {offsets = [0, 64], sizes = [16, 32], strides = [1, 1]} : vector<16x96xf32> to vector<16x32xf32>
    %13 = vector.shape_cast %12 : vector<16x32xf32> to vector<16x4x8xf32>
    %14 = tpu.transpose %13, [1, 0, 2] : vector<16x4x8xf32> -> vector<4x16x8xf32>
    "tpu.trace_start"() <{level = 10 : i32, message = "hqd,hkd->hqk"}> : () -> ()
    %cst_5 = arith.constant dense<0.000000e+00> : vector<4x16x16xf32>
    %15 = tpu.matmul %8, %11, %cst_5 {dimension_numbers = #tpu.dot_dimension_numbers<[2], [2], [1], [1], [0, 0, 0, 1, 1, 1], [0], [0]>} : vector<4x16x8xf32>, vector<4x16x8xf32>, vector<4x16x16xf32> -> vector<4x16x16xf32>
    "tpu.trace_stop"() : () -> ()
    %16 = tpu.iota {dimensions = array<i32: 0>} : vector<16x16xi32>
    %17 = tpu.iota {dimensions = array<i32: 1>} : vector<16x16xi32>
    %c2_i32 = arith.constant 2 : i32
    %c0_i32 = arith.constant 0 : i32
    %18 = arith.cmpi eq, %c2_i32, %c0_i32 : i32
    %c1_i32 = arith.constant 1 : i32
    %19 = arith.select %18, %c1_i32, %c2_i32 : i32
    %20 = vector.broadcast %19 : i32 to vector<16x16xi32>
    %21 = arith.remsi %16, %20 : vector<16x16xi32>
    %c0_i32_6 = arith.constant 0 : i32
    %22 = vector.broadcast %c0_i32_6 : i32 to vector<16x16xi32>
    %23 = arith.cmpi ne, %21, %22 : vector<16x16xi32>
    %c0_i32_7 = arith.constant 0 : i32
    %24 = vector.broadcast %c0_i32_7 : i32 to vector<16x16xi32>
    %25 = arith.cmpi slt, %21, %24 : vector<16x16xi32>
    %c0_i32_8 = arith.constant 0 : i32
    %26 = arith.cmpi slt, %19, %c0_i32_8 : i32
    %27 = vector.broadcast %26 : i1 to vector<16x16xi1>
    %28 = vector.broadcast %27 : vector<16x16xi1> to vector<16x16xi1>
    %29 = arith.xori %25, %28 : vector<16x16xi1>
    %30 = arith.andi %29, %23 : vector<16x16xi1>
    %31 = vector.broadcast %19 : i32 to vector<16x16xi32>
    %32 = arith.addi %21, %31 : vector<16x16xi32>
    %33 = arith.select %30, %32, %21 : vector<16x16xi1>, vector<16x16xi32>
    %c2_i32_9 = arith.constant 2 : i32
    %c0_i32_10 = arith.constant 0 : i32
    %34 = arith.cmpi eq, %c2_i32_9, %c0_i32_10 : i32
    %c1_i32_11 = arith.constant 1 : i32
    %35 = arith.select %34, %c1_i32_11, %c2_i32_9 : i32
    %36 = vector.broadcast %35 : i32 to vector<16x16xi32>
    %37 = arith.remsi %17, %36 : vector<16x16xi32>
    %c0_i32_12 = arith.constant 0 : i32
    %38 = vector.broadcast %c0_i32_12 : i32 to vector<16x16xi32>
    %39 = arith.cmpi ne, %37, %38 : vector<16x16xi32>
    %c0_i32_13 = arith.constant 0 : i32
    %40 = vector.broadcast %c0_i32_13 : i32 to vector<16x16xi32>
    %41 = arith.cmpi slt, %37, %40 : vector<16x16xi32>
    %c0_i32_14 = arith.constant 0 : i32
    %42 = arith.cmpi slt, %35, %c0_i32_14 : i32
    %43 = vector.broadcast %42 : i1 to vector<16x16xi1>
    %44 = vector.broadcast %43 : vector<16x16xi1> to vector<16x16xi1>
    %45 = arith.xori %41, %44 : vector<16x16xi1>
    %46 = arith.andi %45, %39 : vector<16x16xi1>
    %47 = vector.broadcast %35 : i32 to vector<16x16xi32>
    %48 = arith.addi %37, %47 : vector<16x16xi32>
    %49 = arith.select %46, %48, %37 : vector<16x16xi1>, vector<16x16xi32>
    %50 = arith.cmpi eq, %33, %49 : vector<16x16xi32>
    %cst_15 = arith.constant 0.000000e+00 : f32
    %cst_16 = arith.constant -1.000000e+30 : f32
    %51 = vector.broadcast %cst_15 : f32 to vector<16x16xf32>
    %52 = vector.broadcast %cst_16 : f32 to vector<16x16xf32>
    %53 = arith.select %50, %51, %52 : vector<16x16xi1>, vector<16x16xf32>
    %54 = vector.shape_cast %53 : vector<16x16xf32> to vector<1x16x16xf32>
    %55 = vector.broadcast %54 : vector<1x16x16xf32> to vector<4x16x16xf32>
    %56 = arith.addf %15, %55 : vector<4x16x16xf32>
    %cst_17 = arith.constant dense<0xFF800000> : vector<4x16xf32>
    %57 = vector.multi_reduction <maximumf>, %56, %cst_17 [2] : vector<4x16x16xf32> to vector<4x16xf32>
    %58 = vector.shape_cast %57 : vector<4x16xf32> to vector<4x16x1xf32>
    %59 = vector.broadcast %58 : vector<4x16x1xf32> to vector<4x16x16xf32>
    %60 = arith.subf %56, %59 : vector<4x16x16xf32>
    %61 = math.exp %60 : vector<4x16x16xf32>
    %cst_18 = arith.constant dense<0.000000e+00> : vector<4x16xf32>
    %62 = vector.multi_reduction <add>, %61, %cst_18 [2] : vector<4x16x16xf32> to vector<4x16xf32>
    %63 = vector.shape_cast %62 : vector<4x16xf32> to vector<4x16x1xf32>
    %64 = vector.broadcast %63 : vector<4x16x1xf32> to vector<4x16x16xf32>
    %65 = arith.divf %61, %64 : vector<4x16x16xf32>
    "tpu.trace_start"() <{level = 10 : i32, message = "hqk,hkd->hqd"}> : () -> ()
    %cst_19 = arith.constant dense<0.000000e+00> : vector<4x16x8xf32>
    %66 = tpu.matmul %65, %14, %cst_19 {dimension_numbers = #tpu.dot_dimension_numbers<[2], [1], [1], [2], [0, 0, 0, 1, 1, 2], [0], [0]>} : vector<4x16x16xf32>, vector<4x16x8xf32>, vector<4x16x8xf32> -> vector<4x16x8xf32>
    "tpu.trace_stop"() : () -> ()
    %67 = tpu.transpose %66, [1, 0, 2] : vector<4x16x8xf32> -> vector<16x4x8xf32>
    %68 = vector.shape_cast %67 : vector<16x4x8xf32> to vector<16x32xf32>
    %c0_20 = arith.constant 0 : index
    %c0_21 = arith.constant 0 : index
    %69 = vector.load %arg4[%c0_20, %c0_21] : memref<3x32xf32, #tpu.memory_space<vmem>>, vector<3x32xf32>
    %c0_22 = arith.constant 0 : index
    %c0_23 = arith.constant 0 : index
    %70 = vector.load %arg3[%c0_22, %c0_23] : memref<32x32xf32, #tpu.memory_space<vmem>>, vector<32x32xf32>
    %cst_24 = arith.constant dense<0.000000e+00> : vector<16x32xf32>
    %71 = tpu.matmul %68, %70, %cst_24 {dimension_numbers = #tpu.dot_dimension_numbers<[1], [0], [0], [1], [0, 0, 1, 1], [], []>} : vector<16x32xf32>, vector<32x32xf32>, vector<16x32xf32> -> vector<16x32xf32>
    %72 = vector.extract_strided_slice %69 {offsets = [0, 0], sizes = [1, 32], strides = [1, 1]} : vector<3x32xf32> to vector<1x32xf32>
    %73 = vector.broadcast %72 : vector<1x32xf32> to vector<16x32xf32>
    %74 = arith.addf %71, %73 : vector<16x32xf32>
    %75 = arith.addf %0, %74 : vector<16x32xf32>
    %cst_25 = arith.constant dense<0.000000e+00> : vector<16xf32>
    %76 = vector.multi_reduction <add>, %75, %cst_25 [1] : vector<16x32xf32> to vector<16xf32>
    %77 = vector.shape_cast %76 : vector<16xf32> to vector<16x1xf32>
    %cst_26 = arith.constant 3.200000e+01 : f32
    %78 = vector.broadcast %cst_26 : f32 to vector<16x1xf32>
    %79 = arith.divf %77, %78 : vector<16x1xf32>
    %80 = vector.broadcast %79 : vector<16x1xf32> to vector<16x32xf32>
    %81 = arith.subf %75, %80 : vector<16x32xf32>
    %82 = arith.mulf %81, %81 : vector<16x32xf32>
    %cst_27 = arith.constant dense<0.000000e+00> : vector<16xf32>
    %83 = vector.multi_reduction <add>, %82, %cst_27 [1] : vector<16x32xf32> to vector<16xf32>
    %84 = vector.shape_cast %83 : vector<16xf32> to vector<16x1xf32>
    %cst_28 = arith.constant 3.200000e+01 : f32
    %85 = vector.broadcast %cst_28 : f32 to vector<16x1xf32>
    %86 = arith.divf %84, %85 : vector<16x1xf32>
    %cst_29 = arith.constant 9.99999974E-6 : f32
    %87 = vector.broadcast %cst_29 : f32 to vector<16x1xf32>
    %88 = arith.addf %86, %87 : vector<16x1xf32>
    %89 = math.rsqrt %88 : vector<16x1xf32>
    %90 = vector.broadcast %89 : vector<16x1xf32> to vector<16x32xf32>
    %91 = arith.mulf %81, %90 : vector<16x32xf32>
    %92 = vector.extract_strided_slice %69 {offsets = [1, 0], sizes = [1, 32], strides = [1, 1]} : vector<3x32xf32> to vector<1x32xf32>
    %93 = vector.broadcast %92 : vector<1x32xf32> to vector<16x32xf32>
    %94 = arith.mulf %91, %93 : vector<16x32xf32>
    %95 = vector.extract_strided_slice %69 {offsets = [2, 0], sizes = [1, 32], strides = [1, 1]} : vector<3x32xf32> to vector<1x32xf32>
    %96 = vector.broadcast %95 : vector<1x32xf32> to vector<16x32xf32>
    %97 = arith.addf %94, %96 : vector<16x32xf32>
    %c0_30 = arith.constant 0 : index
    %c0_31 = arith.constant 0 : index
    %98 = vector.load %arg5[%c0_30, %c0_31] : memref<16x32xf32, #tpu.memory_space<vmem>>, vector<16x32xf32>
    tpu.vector_store %arg5[%c0_30, %c0_31], %97 {strides = array<i32>} : memref<16x32xf32, #tpu.memory_space<vmem>>, vector<16x32xf32>,
    return
  }
}

</mosaic_0001>

<bundles_post_ra>
// kernel: tpu_custom_call.1
= control target key start
LH: loop header
LB: loop body
LE: loop exit
PB: predicated region body
PF: predicated region fallthrough
CT: control target
= control target key end

     0   :  { %10 = vsyncpa [#allocation3], 0  ;;  %s3039_s0 = inlined_call_operand.hbm [shape: f32[16,32], index: 0, kind: input, shape index: {}]   ;;  %s3040_s1 = inlined_call_operand.hbm [shape: f32[32,96], index: 1, kind: input, shape index: {}]   ;;  %s3041_s2 = inlined_call_operand.vmem [shape: f32[1,96], index: 2, kind: input, shape index: {}]   ;;  %s3042_s3 = inlined_call_operand.hbm [shape: f32[32,32], index: 3, kind: input, shape index: {}]   ;;  %s3043_s4 = inlined_call_operand.vmem [shape: f32[3,32], index: 4, kind: input, shape index: {}]   ;;  %s3044_s5 = inlined_call_operand.hbm [shape: f32[16,32], index: 5, kind: output, shape index: {}]  }
   0x1   :  { %11 = vsyncpa [#allocation6], 0 }
   0x2   :  { %12 = vsyncpa [#allocation4], 0  ;;  %s2609_s18 = smov [#allocation5]   ;;  %s2610_s20 = smov [#allocation2]  }
   0x3   :  { %s30_s19 = sshll.u32 %s2609_s18, 4  ;;  %s18_s21 = sshll.u32 %s2610_s20, 4  ;;  %s31_s19 = int_to_ptr.vmem [resolvable:$true] %s30_s19  ;;  %s19_s21 = int_to_ptr.vmem [resolvable:$true] %s18_s21 }
   0x4   :  { %s2531_s22 = scalar_lea.vmem %s31_s19, 512  ;;  %p2536_p1 = scmp.lt.s32.totalorder %s31_s19, %s31_s19 }
   0x5   :  { %p2532_p0 = scmp.ne.s32.totalorder %s31_s19, %s2531_s22  ;;  %p2537_p2 = scmp.lt.s32.totalorder %s2531_s22, %s2531_s22 }
   0x7   :  { %p2538_p3 = por %p2537_p2, %p2536_p1 }
   0x9   :  { %p2539_p4 = pnand %p2538_p3, %p2532_p0 }
   0xb   :  { %2542 = shalt.err (!%p2539_p4)
}
   0xc   :  { %s2611_s23 = smov 128   ;;  %s2612_s24 = smov 8  }
   0xd   :  { %36 = dma.hbm_to_vmem [thread:$0]  %s3040_s1, 512, %s31_s19, [#allocation6], %s2611_s23, %s2611_s23, %s2612_s24  }
   0xe   :  { %s2551_s27 = scalar_lea.vmem %s19_s21, 256  ;;  %p2556_p6 = scmp.lt.s32.totalorder %s19_s21, %s19_s21 }
   0xf   :  { %p2552_p5 = scmp.ne.s32.totalorder %s19_s21, %s2551_s27  ;;  %p2557_p7 = scmp.lt.s32.totalorder %s2551_s27, %s2551_s27 }
  0x11   :  { %p2558_p8 = por %p2557_p7, %p2556_p6 }
  0x13   :  { %p2559_p9 = pnand %p2558_p8, %p2552_p5 }
  0x15   :  { %2562 = shalt.err (!%p2559_p9)
}
  0x16   :  { %24 = dma.hbm_to_vmem [thread:$0]  %s3039_s0, 256, %s19_s21, [#allocation3], %s2611_s23, %s2611_s23, %s2612_s24  }
  0x17   :  { %s2613_s30 = smov [#allocation7]  }
  0x18   :  { %s44_s6 = sshll.u32 %s2613_s30, 4  ;;  %s45_s6 = int_to_ptr.vmem [resolvable:$true] %s44_s6 }
  0x19   :  { %s2571_s7 = scalar_lea.vmem %s45_s6, 512  ;;  %p2576_p11 = scmp.lt.s32.totalorder %s45_s6, %s45_s6 }
  0x1a   :  { %p2572_p10 = scmp.ne.s32.totalorder %s45_s6, %s2571_s7  ;;  %p2577_p12 = scmp.lt.s32.totalorder %s2571_s7, %s2571_s7 }
  0x1c   :  { %p2578_p13 = por %p2577_p12, %p2576_p11 }
  0x1e   :  { %p2579_p0 = pnand %p2578_p13, %p2572_p10 }
  0x20   :  { %2582 = shalt.err (!%p2579_p0)
}
  0x21   :  { %50 = dma.hbm_to_vmem [thread:$0]  %s3042_s3, 512, %s45_s6, [#allocation6], %s2611_s23, %s2611_s23, %s2612_s24  }
  0x22   :  { %2603 = dma.done.wait [#allocation3], 256  }
  0x23   :  { %2604 = vsyncadd [#allocation3], 4294967040 }
  0x24   :  { %2605 = dma.done.wait [#allocation6], 1024  }
  0x25   :  { %2606 = vsyncadd [#allocation6], 4294966272  ;;  %vm75_vm0 = vcmask 261120   ;;  %v67_v0 = vld [vmem:[#allocation5 + $0x18] sm:$0xff]  ;;  %v66_v1 = vld [vmem:[#allocation5 + $0x10] sm:$0xff]  ;;  %s2614_s9 = smov 104   ;;  %v182_v15 = vlaneseq }
  0x26   :  { %2391 = vmatprep.subr.mxu0 %v67_v0  ;;  %v62_v2 = vld [vmem:[#allocation2] sm:$0xff]  ;;  %v65_v3 = vld [vmem:[#allocation5 + $0x8] sm:$0xff]  ;;  %v64_v4 = vld [vmem:[#allocation5] sm:$0xff]  ;;  %s2615_s10 = smov 120   ;;  %s2616_s11 = smov 112   ;;  %vm1086_vm1 = vcmask 64512  }
  0x27   :  { %2392 = vmatpush3.msra.mxu0 %v67_v0  ;;  %2399 = vmatprep.mubr.msk.f32.mxu0 %vm75_vm0, %v62_v2  ;;  %v63_v5 = vld [vmem:[#allocation2 + $0x8] sm:$0xff]  ;;  %v2302_v6 = vld [vmem:[%s3041_s2] ss:$0 sm:$0xff]  ;;  %s2617_s2 = smov 96   ;;  %v2618_v13 = vmov 1983009808  }
  0x28   :  { %2393 = vmatprep.subr.mxu0 %v66_v1  ;;  %v180_v14 = vunpack.c.l.s4 %v2618_v13  ;;  %v2703_v19 = vshrl.u32 %v182_v15, 7  ;;  %v2619_v20 = vmov 1934713408   ;;  %vm1435_vm4 = vcmask 130048   ;;  %s2621_s12 = smov 64   ;;  %s2622_s13 = smov 16  }
  0x29   :  { %2394 = vmatpush3.msra.mxu0 %v66_v1  ;;  %v212_v21 = vunpack.c.l.s4 %v2619_v20  ;;  %s2623_s14 = smov 24   ;;  %vm2148_vm5 = vcmask 195584  }
  0x2a   :  { %2395 = vmatprep.subr.mxu0 %v65_v3  ;;  %v181_v18 = vunpack.c.0.s8 %v180_v14 }
  0x2b   :  { %2396 = vmatpush3.msra.mxu0 %v65_v3  ;;  %v213_v25 = vunpack.c.0.s8 %v212_v21 }
  0x2c   :  { %2397 = vmatprep.subr.mxu0 %v64_v4  ;;  %v2714_v24 = vsub.s32 %v181_v18, %v2703_v19 }
  0x2d   :  { %2398 = vmatpush3.msra.mxu0 %v64_v4  ;;  %v2733_v34 = vsub.s32 %v213_v25, %v2703_v19 }
  0x2e   :  { %2400 = vmatmul.mubr.msk.f32.vlgmr.msra.gmra.mxu0 %vm75_vm0, %v63_v5 }
  0xee   :  { %v2401_v7 = vpop.f32.mrf.mxu0 }
  0xef   :  { %v2678_v8 = vadd.f32 %v2401_v7, %v2302_v6 }
  0xf0   :  { %v148_v9 = vpop.f32.mrf.mxu0 }
  0xf1   :  { %173 = vrot.lane.b32.xlu1 %v2678_v8, %s2614_s9  ;;  %161 = vrot.lane.b32.xlu0 %v2678_v8, %s2615_s10  ;;  %v2682_v10 = vadd.f32 %v2302_v6, %v148_v9 }
  0xf5   :  { %167 = vrot.lane.b32.xlu0 %v2678_v8, %s2616_s11  ;;  %159 = vrot.lane.b32.xlu1 %v2682_v10, %s2615_s10 }
  0xf9   :  { %165 = vrot.lane.b32.xlu0 %v2682_v10, %s2616_s11  ;;  %171 = vrot.lane.b32.xlu1 %v2682_v10, %s2614_s9 }
  0xfd   :  { %451 = vrot.lane.b32.xlu0 %v2678_v8, %s2617_s2 }
 0x101   :  { %449 = vrot.lane.b32.xlu0 %v2682_v10, %s2617_s2 }
 0x163   :  { %v2692_v11 = vpop.permute.xlu1 %173  ;;  %v2694_v12 = vpop.permute.xlu0 %161 }
 0x164   :  { %455 = vrot.lane.b32.xlu1 %v2694_v12, %s2617_s2  ;;  %v261_v1 = vcombine.low %v2694_v12, %v2692_v11  ;;  %v262_v5 = vcombine.high %v2694_v12, %v2692_v11 }
 0x166   :  { %v269_v7 = vrot.slane %v261_v1, %v2714_v24 }
 0x167   :  { %v2698_v16 = vpop.permute.xlu0 %167  ;;  %v2700_v17 = vpop.permute.xlu1 %159 }
 0x168   :  { %459 = vrot.lane.b32.xlu0 %v2698_v16, %s2617_s2  ;;  %463 = vrot.lane.b32.xlu1 %v2692_v11, %s2617_s2  ;;  %v245_v0 = vcombine.low %v2678_v8, %v2698_v16  ;;  %v246_v2 = vcombine.high %v2678_v8, %v2698_v16 }
 0x16a   :  { %v253_v6 = vrot.slane %v245_v0, %v2714_v24  ;;  %v260_v9 = vrot.slane %v246_v2, %v2714_v24 }
 0x16b   :  { %v2709_v22 = vpop.permute.xlu0 %165  ;;  %v2711_v23 = vpop.permute.xlu1 %171 }
 0x16c   :  { %457 = vrot.lane.b32.xlu0 %v2709_v22, %s2617_s2  ;;  %v177_v26 = vcombine.low %v2682_v10, %v2709_v22  ;;  %v178_v27 = vcombine.high %v2682_v10, %v2709_v22  ;;  %v193_v28 = vcombine.low %v2700_v17, %v2711_v23  ;;  %v194_v29 = vcombine.high %v2700_v17, %v2711_v23 }
 0x16d   :  { %453 = vrot.lane.b32.xlu1 %v2700_v17, %s2617_s2 }
 0x16e   :  { %v185_v30 = vrot.slane %v177_v26, %v2714_v24  ;;  %v192_v31 = vrot.slane %v178_v27, %v2714_v24  ;;  %v201_v32 = vrot.slane %v193_v28, %v2714_v24  ;;  %v208_v33 = vrot.slane %v194_v29, %v2714_v24 }
 0x16f   :  { %v452_v63 = vpop.permute.xlu0 %451  ;;  %v276_v26 = vrot.slane %v262_v5, %v2714_v24  ;;  %v277_v27 = vcombine.low %v253_v6, %v269_v7  ;;  %v278_v28 = vcombine.high %v253_v6, %v269_v7 }
 0x170   :  { %v209_v35 = vcombine.low %v185_v30, %v201_v32  ;;  %v210_v36 = vcombine.high %v185_v30, %v201_v32  ;;  %v225_v37 = vcombine.low %v192_v31, %v208_v33  ;;  %v226_v38 = vcombine.high %v192_v31, %v208_v33 }
 0x171   :  { %461 = vrot.lane.b32.xlu1 %v2711_v23, %s2617_s2  ;;  %v293_v33 = vcombine.low %v260_v9, %v276_v26 }
 0x172   :  { %v217_v39 = vrot.slane %v209_v35, %v2733_v34  ;;  %v224_v40 = vrot.slane %v210_v36, %v2733_v34  ;;  %v233_v41 = vrot.slane %v225_v37, %v2733_v34  ;;  %v240_v42 = vrot.slane %v226_v38, %v2733_v34 }
 0x173   :  { %v450_v3 = vpop.permute.xlu0 %449  ;;  %v294_v35 = vcombine.high %v260_v9, %v276_v26 }
 0x174   :  { %v313_v43 = vcombine.low %v217_v39, %v224_v40  ;;  %v2305_v44 = vcombine.high %v217_v39, %v224_v40  ;;  %v329_v45 = vcombine.low %v233_v41, %v240_v42  ;;  %v2306_v46 = vcombine.high %v233_v41, %v240_v42 }
 0x175   :  { %v285_v42 = vrot.slane %v277_v27, %v2733_v34 }
 0x176   :  { %v320_v47 = vrot.slane %v313_v43, %v2714_v24  ;;  %v328_v48 = vrot.slane %v2305_v44, %v2714_v24  ;;  %v336_v49 = vrot.slane %v329_v45, %v2714_v24  ;;  %v344_v50 = vrot.slane %v2306_v46, %v2714_v24 }
 0x177   :  { %v292_v43 = vrot.slane %v278_v28, %v2733_v34 }
 0x178   :  { %v345_v51 = vcombine.low %v320_v47, %v328_v48  ;;  %v346_v52 = vcombine.high %v320_v47, %v328_v48  ;;  %v361_v53 = vcombine.low %v336_v49, %v344_v50  ;;  %v362_v54 = vcombine.high %v336_v49, %v344_v50 }
 0x179   :  { %v301_v48 = vrot.slane %v293_v33, %v2733_v34  ;;  %v308_v49 = vrot.slane %v294_v35, %v2733_v34 }
 0x17a   :  { %v353_v55 = vrot.slane %v345_v51, %v2733_v34  ;;  %v369_v56 = vrot.slane %v361_v53, %v2733_v34  ;;  %v2748_v57 = vrot.slane %v346_v52, %v2733_v34  ;;  %v2751_v58 = vrot.slane %v362_v54, %v2733_v34 }
 0x17c   :  { %v377_v59 = vcombine.low %v353_v55, %v369_v56  ;;  %v378_v60 = vcombine.high %v353_v55, %v369_v56  ;;  %v379_v61 = vcombine.low %v2748_v57, %v2751_v58  ;;  %v380_v62 = vcombine.high %v2748_v57, %v2751_v58 }
 0x17d   :  { %v1043_v57 = vadd.s32 8, %v2703_v19  ;;  %v1045_v58 = vand.u32 127, %v182_v15 }
 0x17e   :  { %2406 = vmatprep.mubr.msk.f32.mxu1 %vm1086_vm1, %v377_v59  ;;  %2413 = vmatprep.mubr.msk.f32.mxu0 %vm1086_vm1, %v378_v60  ;;  %v381_v59 = vcombine.low %v285_v42, %v292_v43  ;;  %v2307_v60 = vcombine.high %v285_v42, %v292_v43 }
 0x1d6   :  { %v456_v4 = vpop.permute.xlu1 %455 }
 0x1da   :  { %v460_v13 = vpop.permute.xlu0 %459  ;;  %v464_v14 = vpop.permute.xlu1 %463 }
 0x1db   :  { %v541_v18 = vcombine.low %v452_v63, %v460_v13  ;;  %v542_v20 = vcombine.high %v452_v63, %v460_v13  ;;  %v557_v21 = vcombine.low %v456_v4, %v464_v14  ;;  %v558_v25 = vcombine.high %v456_v4, %v464_v14 }
 0x1dc   :  { %v397_v13 = vcombine.low %v301_v48, %v308_v49  ;;  %v2308_v14 = vcombine.high %v301_v48, %v308_v49 }
 0x1dd   :  { %v549_v29 = vrot.slane %v541_v18, %v2714_v24  ;;  %v556_v30 = vrot.slane %v542_v20, %v2714_v24  ;;  %v565_v31 = vrot.slane %v557_v21, %v2714_v24  ;;  %v572_v32 = vrot.slane %v558_v25, %v2714_v24 }
 0x1de   :  { %v458_v40 = vpop.permute.xlu0 %457 }
 0x1df   :  { %v573_v36 = vcombine.low %v549_v29, %v565_v31  ;;  %v574_v37 = vcombine.high %v549_v29, %v565_v31  ;;  %v589_v38 = vcombine.low %v556_v30, %v572_v32  ;;  %v590_v39 = vcombine.high %v556_v30, %v572_v32  ;;  %v454_v41 = vpop.permute.xlu1 %453 }
 0x1e0   :  { %v473_v50 = vcombine.low %v450_v3, %v458_v40  ;;  %v474_v51 = vcombine.high %v450_v3, %v458_v40  ;;  %v388_v30 = vrot.slane %v381_v59, %v2714_v24  ;;  %v396_v31 = vrot.slane %v2307_v60, %v2714_v24 }
 0x1e1   :  { %v581_v44 = vrot.slane %v573_v36, %v2733_v34  ;;  %v588_v45 = vrot.slane %v574_v37, %v2733_v34  ;;  %v597_v46 = vrot.slane %v589_v38, %v2733_v34  ;;  %v604_v47 = vrot.slane %v590_v39, %v2733_v34 }
 0x1e2   :  { %v481_v6 = vrot.slane %v473_v50, %v2714_v24  ;;  %v488_v3 = vrot.slane %v474_v51, %v2714_v24  ;;  %v404_v39 = vrot.slane %v397_v13, %v2714_v24  ;;  %v412_v40 = vrot.slane %v2308_v14, %v2714_v24 }
 0x1e3   :  { %v462_v52 = vpop.permute.xlu1 %461  ;;  %v677_v53 = vcombine.low %v581_v44, %v588_v45  ;;  %v2311_v54 = vcombine.high %v581_v44, %v588_v45  ;;  %v693_v55 = vcombine.low %v597_v46, %v604_v47  ;;  %v2312_v56 = vcombine.high %v597_v46, %v604_v47 }
 0x1e4   :  { %v489_v63 = vcombine.low %v454_v41, %v462_v52  ;;  %v490_v0 = vcombine.high %v454_v41, %v462_v52  ;;  %v430_v14 = vcombine.high %v404_v39, %v412_v40 }
 0x1e5   :  { %v684_v1 = vrot.slane %v677_v53, %v2714_v24  ;;  %v692_v2 = vrot.slane %v2311_v54, %v2714_v24  ;;  %v700_v4 = vrot.slane %v693_v55, %v2714_v24  ;;  %v708_v5 = vrot.slane %v2312_v56, %v2714_v24 }
 0x1e6   :  { %v497_v7 = vrot.slane %v489_v63, %v2714_v24  ;;  %v504_v9 = vrot.slane %v490_v0, %v2714_v24  ;;  %v413_v53 = vcombine.low %v388_v30, %v396_v31  ;;  %v429_v54 = vcombine.low %v404_v39, %v412_v40 }
 0x1e7   :  { %v709_v18 = vcombine.low %v684_v1, %v692_v2  ;;  %v725_v20 = vcombine.low %v700_v4, %v708_v5  ;;  %v710_v45 = vcombine.high %v684_v1, %v692_v2  ;;  %v726_v46 = vcombine.high %v700_v4, %v708_v5 }
 0x1e8   :  { %v505_v21 = vcombine.low %v481_v6, %v497_v7  ;;  %v506_v25 = vcombine.high %v481_v6, %v497_v7  ;;  %v521_v26 = vcombine.low %v488_v3, %v504_v9  ;;  %v522_v27 = vcombine.high %v488_v3, %v504_v9 }
 0x1e9   :  { %v717_v28 = vrot.slane %v709_v18, %v2733_v34  ;;  %v733_v29 = vrot.slane %v725_v20, %v2733_v34  ;;  %v724_v59 = vrot.slane %v710_v45, %v2733_v34  ;;  %v740_v60 = vrot.slane %v726_v46, %v2733_v34 }
 0x1ea   :  { %v513_v32 = vrot.slane %v505_v21, %v2733_v34  ;;  %v520_v33 = vrot.slane %v506_v25, %v2733_v34  ;;  %v529_v35 = vrot.slane %v521_v26, %v2733_v34  ;;  %v536_v36 = vrot.slane %v522_v27, %v2733_v34 }
 0x1eb   :  { %v741_v37 = vcombine.low %v717_v28, %v733_v29  ;;  %v742_v38 = vcombine.high %v717_v28, %v733_v29  ;;  %v421_v4 = vrot.slane %v413_v53, %v2733_v34  ;;  %v437_v5 = vrot.slane %v429_v54, %v2733_v34 }
 0x1ec   :  { %v609_v41 = vcombine.low %v513_v32, %v520_v33  ;;  %v2309_v42 = vcombine.high %v513_v32, %v520_v33  ;;  %v625_v43 = vcombine.low %v529_v35, %v536_v36  ;;  %v2310_v44 = vcombine.high %v529_v35, %v536_v36 }
 0x1ed   :  { %2402 = vmatprep.subr.msk.mxu1 %vm1086_vm1, %v741_v37  ;;  %2409 = vmatprep.subr.msk.mxu0 %vm1086_vm1, %v742_v38  ;;  %v743_v6 = vcombine.low %v724_v59, %v740_v60  ;;  %v744_v3 = vcombine.high %v724_v59, %v740_v60  ;;  %v414_v7 = vcombine.high %v388_v30, %v396_v31  ;;  %v1074_v29 = vand.u32 1, %v1045_v58 }
 0x1ee   :  { %v616_v47 = vrot.slane %v609_v41, %v2714_v24  ;;  %v624_v48 = vrot.slane %v2309_v42, %v2714_v24  ;;  %v632_v49 = vrot.slane %v625_v43, %v2714_v24  ;;  %v640_v50 = vrot.slane %v2310_v44, %v2714_v24  ;;  %2403 = vmatpush3.xpose.msk.msra.mxu1 %vm1086_vm1, %v741_v37 }
 0x1ef   :  { %2410 = vmatpush3.xpose.msk.msra.mxu0 %vm1086_vm1, %v742_v38  ;;  %v445_v18 = vcombine.low %v421_v4, %v437_v5  ;;  %v446_v20 = vcombine.high %v421_v4, %v437_v5  ;;  %v428_v26 = vrot.slane %v414_v7, %v2733_v34  ;;  %v444_v27 = vrot.slane %v430_v14, %v2733_v34 }
 0x1f0   :  { %v641_v51 = vcombine.low %v616_v47, %v624_v48  ;;  %v657_v52 = vcombine.low %v632_v49, %v640_v50  ;;  %v642_v63 = vcombine.high %v616_v47, %v624_v48  ;;  %v658_v0 = vcombine.high %v632_v49, %v640_v50 }
 0x1f1   :  { %v448_v28 = vcombine.high %v428_v26, %v444_v27  ;;  %v1050_v30 = vand.u32 1, %v2703_v19  ;;  %v2620_v31 = vmov -1e+30  }
 0x1f2   :  { %v649_v55 = vrot.slane %v641_v51, %v2733_v34  ;;  %v665_v56 = vrot.slane %v657_v52, %v2733_v34  ;;  %v656_v9 = vrot.slane %v642_v63, %v2733_v34  ;;  %v672_v13 = vrot.slane %v658_v0, %v2733_v34 }
 0x1f3   :  { %vm1082_vm3 = vcmp.eq.s32.totalorder %v1050_v30, %v1074_v29 }
 0x1f4   :  { %v673_v1 = vcombine.low %v649_v55, %v665_v56  ;;  %v674_v2 = vcombine.high %v649_v55, %v665_v56  ;;  %v675_v21 = vcombine.low %v656_v9, %v672_v13  ;;  %v676_v25 = vcombine.high %v656_v9, %v672_v13 }
 0x1f5   :  { %v1084_v36 = vsel %vm1082_vm3, 0.0, %v2620_v31 }
 0x1f6   :  { %2404 = vmatprep.subr.msk.mxu1 %vm1086_vm1, %v673_v1  ;;  %2411 = vmatprep.subr.msk.mxu0 %vm1086_vm1, %v674_v2 }
 0x1f7   :  { %2405 = vmatpush3.xpose.msk.msra.mxu1 %vm1086_vm1, %v673_v1  ;;  %2412 = vmatpush3.xpose.msk.msra.mxu0 %vm1086_vm1, %v674_v2 }
 0x1f8   :  { %2416 = vmatprep.subr.msk.mxu1 %vm1086_vm1, %v743_v6  ;;  %2423 = vmatprep.subr.msk.mxu0 %vm1086_vm1, %v744_v3 }
 0x1fa   :  { %2407 = vmatmul.mubr.msk.f32.vlgmr.msra.gmra.mxu1 %vm1086_vm1, %v445_v18  ;;  %2414 = vmatmul.mubr.msk.f32.vlgmr.msra.gmra.mxu0 %vm1086_vm1, %v446_v20 }
 0x1fb   :  { %2417 = vmatpush3.xpose.msk.msra.mxu1 %vm1086_vm1, %v743_v6  ;;  %2420 = vmatprep.mubr.msk.f32.mxu1 %vm1086_vm1, %v379_v61  ;;  %v447_v61 = vcombine.low %v428_v26, %v444_v27 }
 0x1fc   :  { %2424 = vmatpush3.xpose.msk.msra.mxu0 %vm1086_vm1, %v744_v3  ;;  %2427 = vmatprep.mubr.msk.f32.mxu0 %vm1086_vm1, %v380_v62  ;;  %v1057_v62 = vand.u32 1, %v1043_v57 }
 0x1fd   :  { %2418 = vmatprep.subr.msk.mxu1 %vm1086_vm1, %v675_v21  ;;  %2425 = vmatprep.subr.msk.mxu0 %vm1086_vm1, %v676_v25 }
 0x1fe   :  { %vm1083_vm2 = vcmp.eq.s32.totalorder %v1057_v62, %v1074_v29 }
 0x1ff   :  { %2419 = vmatpush3.xpose.msk.msra.mxu1 %vm1086_vm1, %v675_v21  ;;  %v1085_v32 = vsel %vm1083_vm2, 0.0, %v2620_v31 }
 0x200   :  { %2426 = vmatpush3.xpose.msk.msra.mxu0 %vm1086_vm1, %v676_v25 }
 0x202   :  { %2421 = vmatmul.mubr.msk.f32.vlgmr.msra.gmra.mxu1 %vm1086_vm1, %v447_v61 }
 0x203   :  { %2428 = vmatmul.mubr.msk.f32.vlgmr.msra.gmra.mxu0 %vm1086_vm1, %v448_v28 }
 0x2ba   :  { %v2408_v33 = vpop.f32.mrf.mxu1  ;;  %v2415_v35 = vpop.f32.mrf.mxu0 }
 0x2bb   :  { %v1171_v37 = vadd.f32 %v2408_v33, %v1085_v32  ;;  %v1258_v43 = vadd.f32 %v2415_v35, %v1085_v32 }
 0x2bc   :  { %v1165_v38 = vpop.f32.mrf.mxu1  ;;  %v1252_v39 = vpop.f32.mrf.mxu0 }
 0x2bd   :  { %v1166_v40 = vadd.f32 %v1165_v38, %v1084_v36  ;;  %v1439_v41 = vsel %vm1435_vm4, %v1171_v37, -inf  ;;  %v1253_v15 = vadd.f32 %v1252_v39, %v1084_v36  ;;  %v1445_v47 = vsel %vm1435_vm4, %v1258_v43, -inf }
 0x2be   :  { %1440 = vmax.xlane.f32.xlu1 %v1439_v41 }
 0x2bf   :  { %v1436_v42 = vsel %vm1435_vm4, %v1166_v40, -inf  ;;  %v1442_v44 = vsel %vm1435_vm4, %v1253_v15, -inf }
 0x2c0   :  { %1437 = vmax.xlane.f32.xlu0 %v1436_v42 }
 0x2c2   :  { %v2422_v45 = vpop.f32.mrf.mxu1 }
 0x2c3   :  { %v2849_v46 = vadd.f32 %v2422_v45, %v1085_v32  ;;  %v2429_v48 = vpop.f32.mrf.mxu0 }
 0x2c4   :  { %1443 = vmax.xlane.f32.xlu0 %v1442_v44  ;;  %v2852_v49 = vadd.f32 %v2429_v48, %v1085_v32 }
 0x2c5   :  { %v1451_v50 = vsel %vm1435_vm4, %v2849_v46, -inf  ;;  %v1426_v53 = vpop.f32.mrf.mxu0 }
 0x2c6   :  { %v1457_v51 = vsel %vm1435_vm4, %v2852_v49, -inf  ;;  %v2872_v54 = vadd.f32 %v1426_v53, %v1084_v36 }
 0x2c8   :  { %1446 = vmax.xlane.f32.xlu0 %v1445_v47 }
 0x2cc   :  { %1452 = vmax.xlane.f32.xlu0 %v1451_v50 }
 0x2cf   :  { %747 = vrot.lane.b32.xlu1 %v2678_v8, %s2621_s12  ;;  %v1339_v8 = vpop.f32.mrf.mxu1 }
 0x2d0   :  { %1458 = vmax.xlane.f32.xlu0 %v1457_v51  ;;  %v2870_v52 = vadd.f32 %v1339_v8, %v1084_v36 }
 0x2d3   :  { %755 = vrot.lane.b32.xlu1 %v2698_v16, %s2621_s12  ;;  %v1448_v16 = vsel %vm1435_vm4, %v2870_v52, -inf }
 0x2d7   :  { %759 = vrot.lane.b32.xlu1 %v2692_v11, %s2621_s12  ;;  %v1454_v11 = vsel %vm1435_vm4, %v2872_v54, -inf }
 0x2db   :  { %745 = vrot.lane.b32.xlu1 %v2682_v10, %s2621_s12 }
 0x2df   :  { %749 = vrot.lane.b32.xlu1 %v2700_v17, %s2621_s12 }
 0x2e6   :  { %751 = vrot.lane.b32.xlu0 %v2694_v12, %s2621_s12 }
 0x303   :  { %1449 = vmax.xlane.f32.xlu1 %v1448_v16 }
 0x307   :  { %1455 = vmax.xlane.f32.xlu1 %v1454_v11 }
 0x318   :  { %753 = vrot.lane.b32.xlu1 %v2709_v22, %s2621_s12 }
 0x347   :  { %v1441_v10 = vpop.xlane.xlu1 %1440 }
 0x348   :  { %v1461_v17 = vsub.f32 %v1171_v37, %v1441_v10 }
 0x349   :  { %v1438_v12 = vpop.xlane.xlu0 %1437 }
 0x34a   :  { %v1470_v55 = vmul.f32 1.442695, %v1461_v17  ;;  %v1460_v56 = vsub.f32 %v1166_v40, %v1438_v12 }
 0x34b   :  { %v748_v1 = vpop.permute.xlu1 %747 }
 0x34c   :  { %2485 = vpow2.f32 %v1470_v55  ;;  %v1468_v59 = vmul.f32 1.442695, %v1460_v56 }
 0x34d   :  { %v1444_v60 = vpop.xlane.xlu0 %1443 }
 0x34e   :  { %2487 = vpow2.f32 %v1468_v59  ;;  %v1462_v63 = vsub.f32 %v1253_v15, %v1444_v60 }
 0x34f   :  { %v756_v3 = vpop.permute.xlu1 %755 }
 0x350   :  { %v1472_v0 = vmul.f32 1.442695, %v1462_v63  ;;  %v837_v14 = vcombine.low %v748_v1, %v756_v3  ;;  %v838_v18 = vcombine.high %v748_v1, %v756_v3 }
 0x351   :  { %v1447_v2 = vpop.xlane.xlu0 %1446 }
 0x352   :  { %2489 = vpow2.f32 %v1472_v0  ;;  %v1463_v4 = vsub.f32 %v1258_v43, %v1447_v2  ;;  %v845_v28 = vrot.slane %v837_v14, %v2714_v24  ;;  %v852_v57 = vrot.slane %v838_v18, %v2714_v24 }
 0x353   :  { %v760_v21 = vpop.permute.xlu1 %759 }
 0x354   :  { %v1474_v5 = vmul.f32 1.442695, %v1463_v4 }
 0x355   :  { %v1453_v6 = vpop.xlane.xlu0 %1452 }
 0x356   :  { %2491 = vpow2.f32 %v1474_v5  ;;  %v1465_v60 = vsub.f32 %v2849_v46, %v1453_v6 }
 0x357   :  { %v746_v0 = vpop.permute.xlu1 %745 }
 0x358   :  { %v1478_v63 = vmul.f32 1.442695, %v1465_v60 }
 0x359   :  { %v2880_v22 = vpop.eup %2485  ;;  %v2882_v7 = vpop.xlane.xlu0 %1458 }
 0x35a   :  { %v1487_v9 = vsel %vm1435_vm4, %v2880_v22, 0.0  ;;  %2493 = vpow2.f32 %v1478_v63  ;;  %v1467_v5 = vsub.f32 %v2852_v49, %v2882_v7 }
 0x35b   :  { %v2886_v13 = vpop.eup %2487  ;;  %1488 = vadd.xlane.f32.xlu0 %v1487_v9  ;;  %v750_v1 = vpop.permute.xlu1 %749 }
 0x35c   :  { %v1484_v20 = vsel %vm1435_vm4, %v2886_v13, 0.0 }
 0x35d   :  { %1485 = vadd.xlane.f32.xlu1 %v1484_v20  ;;  %v752_v25 = vpop.permute.xlu0 %751 }
 0x35e   :  { %v853_v26 = vcombine.low %v752_v25, %v760_v21  ;;  %v854_v27 = vcombine.high %v752_v25, %v760_v21 }
 0x35f   :  { %v2890_v61 = vpop.eup %2489 }
 0x360   :  { %v861_v58 = vrot.slane %v853_v26, %v2714_v24  ;;  %v868_v62 = vrot.slane %v854_v27, %v2714_v24  ;;  %v1490_v29 = vsel %vm1435_vm4, %v2890_v61, 0.0 }
 0x361   :  { %1491 = vadd.xlane.f32.xlu1 %v1490_v29 }
 0x362   :  { %v869_v30 = vcombine.low %v845_v28, %v861_v58  ;;  %v870_v31 = vcombine.high %v845_v28, %v861_v58  ;;  %v885_v32 = vcombine.low %v852_v57, %v868_v62  ;;  %v886_v33 = vcombine.high %v852_v57, %v868_v62 }
 0x363   :  { %v2898_v35 = vpop.eup %2491 }
 0x364   :  { %v877_v36 = vrot.slane %v869_v30, %v2733_v34  ;;  %v884_v37 = vrot.slane %v870_v31, %v2733_v34  ;;  %v893_v38 = vrot.slane %v885_v32, %v2733_v34  ;;  %v900_v39 = vrot.slane %v886_v33, %v2733_v34 }
 0x365   :  { %v1493_v40 = vsel %vm1435_vm4, %v2898_v35, 0.0 }
 0x366   :  { %v973_v41 = vcombine.low %v877_v36, %v884_v37  ;;  %v2315_v15 = vcombine.high %v877_v36, %v884_v37  ;;  %v989_v42 = vcombine.low %v893_v38, %v900_v39  ;;  %v2316_v43 = vcombine.high %v893_v38, %v900_v39  ;;  %1494 = vadd.xlane.f32.xlu0 %v1493_v40 }
 0x367   :  { %v2927_v18 = vpop.eup %2493 }
 0x368   :  { %v980_v44 = vrot.slane %v973_v41, %v2714_v24  ;;  %v988_v45 = vrot.slane %v2315_v15, %v2714_v24  ;;  %v996_v47 = vrot.slane %v989_v42, %v2714_v24  ;;  %v1004_v48 = vrot.slane %v2316_v43, %v2714_v24 }
 0x369   :  { %v1499_v46 = vsel %vm1435_vm4, %v2927_v18, 0.0 }
 0x36a   :  { %v1005_v50 = vcombine.low %v980_v44, %v988_v45  ;;  %v1021_v51 = vcombine.low %v996_v47, %v1004_v48  ;;  %v1006_v8 = vcombine.high %v980_v44, %v988_v45  ;;  %v1022_v53 = vcombine.high %v996_v47, %v1004_v48 }
 0x36c   :  { %v1013_v16 = vrot.slane %v1005_v50, %v2733_v34  ;;  %v1029_v11 = vrot.slane %v1021_v51, %v2733_v34  ;;  %v1020_v10 = vrot.slane %v1006_v8, %v2733_v34  ;;  %v1036_v17 = vrot.slane %v1022_v53, %v2733_v34 }
 0x36e   :  { %v1037_v12 = vcombine.low %v1013_v16, %v1029_v11  ;;  %v2914_v55 = vcombine.high %v1013_v16, %v1029_v11  ;;  %v2916_v56 = vcombine.low %v1020_v10, %v1036_v17  ;;  %v2918_v59 = vcombine.high %v1020_v10, %v1036_v17 }
 0x370   :  { %2430 = vmatprep.subr.mxu1 %v1037_v12 }
 0x371   :  { %2431 = vmatpush3.msra.mxu1 %v1037_v12 }
 0x372   :  { %757 = vrot.lane.b32.xlu1 %v2711_v23, %s2621_s12  ;;  %v1482_v23 = vmul.f32 1.442695, %v1467_v5 }
 0x38c   :  { %v1450_v2 = vpop.xlane.xlu1 %1449 }
 0x38d   :  { %v1464_v4 = vsub.f32 %v2870_v52, %v1450_v2 }
 0x38f   :  { %v1476_v3 = vmul.f32 1.442695, %v1464_v4 }
 0x390   :  { %v1456_v9 = vpop.xlane.xlu1 %1455 }
 0x391   :  { %2495 = vpow2.f32 %v1476_v3  ;;  %v1466_v14 = vsub.f32 %v2872_v54, %v1456_v9 }
 0x393   :  { %v1480_v20 = vmul.f32 1.442695, %v1466_v14 }
 0x394   :  { %v754_v25 = vpop.permute.xlu1 %753 }
 0x395   :  { %2497 = vpow2.f32 %v1480_v20  ;;  %v769_v28 = vcombine.low %v746_v0, %v754_v25  ;;  %v770_v57 = vcombine.high %v746_v0, %v754_v25 }
 0x396   :  { %1500 = vadd.xlane.f32.xlu1 %v1499_v46  ;;  %2499 = vpow2.f32 %v1482_v23 }
 0x397   :  { %v777_v31 = vrot.slane %v769_v28, %v2714_v24  ;;  %v784_v32 = vrot.slane %v770_v57, %v2714_v24 }
 0x39e   :  { %v2931_v6 = vpop.eup %2495 }
 0x39f   :  { %v1496_v49 = vsel %vm1435_vm4, %v2931_v6, 0.0 }
 0x3a0   :  { %1497 = vadd.xlane.f32.xlu0 %v1496_v49 }
 0x3a2   :  { %v2935_v52 = vpop.eup %2497 }
 0x3a3   :  { %v1502_v54 = vsel %vm1435_vm4, %v2935_v52, 0.0  ;;  %v2939_v7 = vpop.eup %2499 }
 0x3a4   :  { %1503 = vadd.xlane.f32.xlu0 %v1502_v54  ;;  %v1505_v21 = vsel %vm1435_vm4, %v2939_v7, 0.0 }
 0x3a8   :  { %1506 = vadd.xlane.f32.xlu0 %v1505_v21 }
 0x3e4   :  { %v1489_v58 = vpop.xlane.xlu0 %1488 }
 0x3e6   :  { %v1486_v26 = vpop.xlane.xlu1 %1485 }
 0x3e7   :  { %2501 = vrcp.f32 %v1486_v26 }
 0x3e8   :  { %2503 = vrcp.f32 %v1489_v58 }
 0x3ea   :  { %v1492_v27 = vpop.xlane.xlu1 %1491 }
 0x3eb   :  { %2505 = vrcp.f32 %v1492_v27 }
 0x3ee   :  { %v758_v62 = vpop.permute.xlu1 %757 }
 0x3ef   :  { %v785_v29 = vcombine.low %v750_v1, %v758_v62  ;;  %v786_v30 = vcombine.high %v750_v1, %v758_v62  ;;  %v1495_v37 = vpop.xlane.xlu0 %1494 }
 0x3f0   :  { %2507 = vrcp.f32 %v1495_v37 }
 0x3f1   :  { %v793_v33 = vrot.slane %v785_v29, %v2714_v24  ;;  %v800_v36 = vrot.slane %v786_v30, %v2714_v24 }
 0x3f3   :  { %v801_v38 = vcombine.low %v777_v31, %v793_v33  ;;  %v802_v39 = vcombine.high %v777_v31, %v793_v33  ;;  %v817_v40 = vcombine.low %v784_v32, %v800_v36  ;;  %v818_v41 = vcombine.high %v784_v32, %v800_v36 }
 0x3f4   :  { %v2502_v15 = vpop.eup %2501 }
 0x3f5   :  { %v809_v42 = vrot.slane %v801_v38, %v2733_v34  ;;  %v816_v43 = vrot.slane %v802_v39, %v2733_v34  ;;  %v825_v44 = vrot.slane %v817_v40, %v2733_v34  ;;  %v832_v45 = vrot.slane %v818_v41, %v2733_v34  ;;  %v2504_v63 = vpop.eup %2503 }
 0x3f6   :  { %v1509_v47 = vmul.f32 %v2502_v15, %v2886_v13  ;;  %v1511_v3 = vmul.f32 %v2504_v63, %v2880_v22 }
 0x3f7   :  { %v905_v48 = vcombine.low %v809_v42, %v816_v43  ;;  %v2313_v50 = vcombine.high %v809_v42, %v816_v43  ;;  %v921_v51 = vcombine.low %v825_v44, %v832_v45  ;;  %v2314_v8 = vcombine.high %v825_v44, %v832_v45 }
 0x3f8   :  { %2434 = vmatprep.mubr.msk.f32.mxu1 %vm1435_vm4, %v1509_v47  ;;  %v2506_v0 = vpop.eup %2505 }
 0x3f9   :  { %v912_v53 = vrot.slane %v905_v48, %v2714_v24  ;;  %v920_v16 = vrot.slane %v2313_v50, %v2714_v24  ;;  %v928_v11 = vrot.slane %v921_v51, %v2714_v24  ;;  %v936_v10 = vrot.slane %v2314_v8, %v2714_v24 }
 0x3fa   :  { %v1513_v9 = vmul.f32 %v2506_v0, %v2890_v61 }
 0x3fb   :  { %v937_v17 = vcombine.low %v912_v53, %v920_v16  ;;  %v953_v12 = vcombine.low %v928_v11, %v936_v10  ;;  %v938_v2 = vcombine.high %v912_v53, %v920_v16  ;;  %v954_v4 = vcombine.high %v928_v11, %v936_v10 }
 0x3fd   :  { %v945_v60 = vrot.slane %v937_v17, %v2733_v34  ;;  %v961_v13 = vrot.slane %v953_v12, %v2733_v34  ;;  %v2508_v5 = vpop.eup %2507  ;;  %v952_v23 = vrot.slane %v938_v2, %v2733_v34  ;;  %v968_v20 = vrot.slane %v954_v4, %v2733_v34 }
 0x3fe   :  { %v1515_v46 = vmul.f32 %v2508_v5, %v2898_v35 }
 0x3ff   :  { %v969_v1 = vcombine.low %v945_v60, %v961_v13  ;;  %v970_v14 = vcombine.high %v945_v60, %v961_v13  ;;  %v971_v22 = vcombine.low %v952_v23, %v968_v20  ;;  %v972_v27 = vcombine.high %v952_v23, %v968_v20  ;;  %v2155_v23 = vld [vmem:[#allocation7 + $0x18] sm:$0xff] }
 0x400   :  { %2458 = vmatprep.subr.mxu0 %v2155_v23 }
 0x401   :  { %2432 = vmatprep.subr.mxu1 %v969_v1  ;;  %2459 = vmatpush3.msra.mxu0 %v2155_v23 }
 0x402   :  { %2433 = vmatpush3.msra.mxu1 %v969_v1 }
 0x403   :  { %2435 = vmatmul.mubr.msk.f32.vlgmr.msra.gmra.mxu1 %vm1435_vm4, %v1511_v3  ;;  %2437 = vmatprep.subr.mxu1 %v2914_v55 }
 0x404   :  { %2438 = vmatpush3.msra.mxu1 %v2914_v55  ;;  %2441 = vmatprep.mubr.msk.f32.mxu1 %vm1435_vm4, %v1513_v9 }
 0x405   :  { %2439 = vmatprep.subr.mxu1 %v970_v14 }
 0x406   :  { %2440 = vmatpush3.msra.mxu1 %v970_v14 }
 0x407   :  { %2442 = vmatmul.mubr.msk.f32.vlgmr.msra.gmra.mxu1 %vm1435_vm4, %v1515_v46  ;;  %2444 = vmatprep.subr.mxu1 %v2916_v56 }
 0x408   :  { %2445 = vmatpush3.msra.mxu1 %v2916_v56 }
 0x409   :  { %2446 = vmatprep.subr.mxu1 %v971_v22 }
 0x40a   :  { %2447 = vmatpush3.msra.mxu1 %v971_v22 }
 0x40b   :  { %2451 = vmatprep.subr.mxu1 %v2918_v59 }
 0x41f   :  { %v1501_v61 = vpop.xlane.xlu1 %1500 }
 0x420   :  { %2509 = vrcp.f32 %v1501_v61 }
 0x429   :  { %v1498_v55 = vpop.xlane.xlu0 %1497 }
 0x42a   :  { %2511 = vrcp.f32 %v1498_v55 }
 0x42d   :  { %v1504_v49 = vpop.xlane.xlu0 %1503  ;;  %v2510_v35 = vpop.eup %2509 }
 0x42e   :  { %2513 = vrcp.f32 %v1504_v49  ;;  %v1519_v26 = vmul.f32 %v2510_v35, %v2927_v18 }
 0x431   :  { %v1507_v54 = vpop.xlane.xlu0 %1506 }
 0x432   :  { %2515 = vrcp.f32 %v1507_v54 }
 0x437   :  { %v2512_v21 = vpop.eup %2511 }
 0x438   :  { %v1517_v25 = vmul.f32 %v2512_v21, %v2931_v6 }
 0x43a   :  { %2448 = vmatprep.mubr.msk.f32.mxu1 %vm1435_vm4, %v1517_v25 }
 0x43b   :  { %v2514_v56 = vpop.eup %2513  ;;  %2449 = vmatmul.mubr.msk.f32.vlgmr.msra.gmra.mxu1 %vm1435_vm4, %v1519_v26 }
 0x43c   :  { %2452 = vmatpush3.msra.mxu1 %v2918_v59  ;;  %v1521_v28 = vmul.f32 %v2514_v56, %v2935_v52 }
 0x43d   :  { %2453 = vmatprep.subr.mxu1 %v972_v27 }
 0x43e   :  { %2454 = vmatpush3.msra.mxu1 %v972_v27  ;;  %2455 = vmatprep.mubr.msk.f32.mxu1 %vm1435_vm4, %v1521_v28 }
 0x43f   :  { %v2516_v57 = vpop.eup %2515 }
 0x440   :  { %v1523_v58 = vmul.f32 %v2516_v57, %v2939_v7 }
 0x442   :  { %2456 = vmatmul.mubr.msk.f32.vlgmr.msra.gmra.mxu1 %vm1435_vm4, %v1523_v58 }
 0x4c3   :  { %v2436_v18 = vpop.f32.mrf.mxu1 }
 0x4c5   :  { %v1596_v6 = vpop.f32.mrf.mxu1 }
 0x4c7   :  { %v2443_v62 = vpop.f32.mrf.mxu1 }
 0x4c9   :  { %v1677_v29 = vpop.f32.mrf.mxu1 }
 0x4fb   :  { %v2450_v30 = vpop.f32.mrf.mxu1 }
 0x4fc   :  { %v1916_v31 = vcombine.low %v2436_v18, %v2450_v30  ;;  %v1917_v32 = vcombine.high %v2436_v18, %v2450_v30  ;;  %v2154_v18 = vld [vmem:[#allocation7 + $0x10] sm:$0xff] }
 0x4fd   :  { %v1758_v33 = vpop.f32.mrf.mxu1  ;;  %2460 = vmatprep.subr.mxu0 %v2154_v18 }
 0x4fe   :  { %v1924_v37 = vrot.slane %v1916_v31, %v2714_v24  ;;  %v1931_v38 = vrot.slane %v1917_v32, %v2714_v24  ;;  %v1848_v39 = vcombine.low %v1596_v6, %v1758_v33  ;;  %v1849_v40 = vcombine.high %v1596_v6, %v1758_v33  ;;  %v2153_v6 = vld [vmem:[#allocation7 + $0x8] sm:$0xff]  ;;  %2461 = vmatpush3.msra.mxu0 %v2154_v18 }
 0x4ff   :  { %2462 = vmatprep.subr.mxu0 %v2153_v6 }
 0x500   :  { %v1856_v50 = vrot.slane %v1848_v39, %v2714_v24  ;;  %v1863_v51 = vrot.slane %v1849_v40, %v2714_v24  ;;  %2463 = vmatpush3.msra.mxu0 %v2153_v6  ;;  %v2152_v40 = vld [vmem:[#allocation7] sm:$0xff]  ;;  %v2272_v6 = vsub.s32 1, %v2703_v19 }
 0x501   :  { %2464 = vmatprep.subr.mxu0 %v2152_v40 }
 0x502   :  { %v2457_v59 = vpop.f32.mrf.mxu1  ;;  %2465 = vmatpush3.msra.mxu0 %v2152_v40 }
 0x503   :  { %v1932_v36 = vcombine.low %v2443_v62, %v2457_v59  ;;  %v1933_v52 = vcombine.high %v2443_v62, %v2457_v59 }
 0x504   :  { %v1839_v7 = vpop.f32.mrf.mxu1 }
 0x505   :  { %v1940_v41 = vrot.slane %v1932_v36, %v2714_v24  ;;  %v1947_v15 = vrot.slane %v1933_v52, %v2714_v24  ;;  %v1864_v42 = vcombine.low %v1677_v29, %v1839_v7  ;;  %v1865_v43 = vcombine.high %v1677_v29, %v1839_v7 }
 0x507   :  { %v1948_v44 = vcombine.low %v1924_v37, %v1940_v41  ;;  %v1949_v45 = vcombine.high %v1924_v37, %v1940_v41  ;;  %v1964_v47 = vcombine.low %v1931_v38, %v1947_v15  ;;  %v1965_v48 = vcombine.high %v1931_v38, %v1947_v15 }
 0x508   :  { %v1872_v8 = vrot.slane %v1864_v42, %v2714_v24  ;;  %v1879_v53 = vrot.slane %v1865_v43, %v2714_v24 }
 0x509   :  { %v1956_v16 = vrot.slane %v1948_v44, %v2733_v34  ;;  %v1963_v11 = vrot.slane %v1949_v45, %v2733_v34  ;;  %v1972_v10 = vrot.slane %v1964_v47, %v2733_v34  ;;  %v1979_v17 = vrot.slane %v1965_v48, %v2733_v34 }
 0x50a   :  { %v1880_v12 = vcombine.low %v1856_v50, %v1872_v8  ;;  %v1881_v60 = vcombine.high %v1856_v50, %v1872_v8  ;;  %v1896_v13 = vcombine.low %v1863_v51, %v1879_v53  ;;  %v1897_v63 = vcombine.high %v1863_v51, %v1879_v53 }
 0x50b   :  { %v2052_v0 = vcombine.low %v1956_v16, %v1963_v11  ;;  %v2343_v1 = vcombine.high %v1956_v16, %v1963_v11  ;;  %v2068_v2 = vcombine.low %v1972_v10, %v1979_v17  ;;  %v2344_v4 = vcombine.high %v1972_v10, %v1979_v17 }
 0x50c   :  { %v1888_v5 = vrot.slane %v1880_v12, %v2733_v34  ;;  %v1895_v3 = vrot.slane %v1881_v60, %v2733_v34  ;;  %v1904_v9 = vrot.slane %v1896_v13, %v2733_v34  ;;  %v1911_v14 = vrot.slane %v1897_v63, %v2733_v34  ;;  %v2151_v13 = vld [vmem:[%s3043_s4] sm:$0x7]  ;;  %s2624_s4 = smov [#allocation8]  }
 0x50d   :  { %v2059_v20 = vrot.slane %v2052_v0, %v2714_v24  ;;  %v2067_v46 = vrot.slane %v2343_v1, %v2714_v24  ;;  %v2075_v22 = vrot.slane %v2068_v2, %v2714_v24  ;;  %v2083_v61 = vrot.slane %v2344_v4, %v2714_v24  ;;  %s2289_s17 = sshll.u32 %s2624_s4, 4  ;;  %s2290_s17 = int_to_ptr.vmem [resolvable:$true] %s2289_s17 }
 0x50e   :  { %v1984_v55 = vcombine.low %v1888_v5, %v1895_v3  ;;  %v2341_v49 = vcombine.high %v1888_v5, %v1895_v3  ;;  %v2000_v54 = vcombine.low %v1904_v9, %v1911_v14  ;;  %v2342_v35 = vcombine.high %v1904_v9, %v1911_v14  ;;  %v2521_v5 = vld [vmem:[#allocation2 + $0x8] sm:$0xff]  ;;  %v2522_v14 = vld [vmem:[#allocation2] sm:$0xff]  ;;  %s2583_s18 = scalar_lea.vmem %s2290_s17, 256  ;;  %p2588_p2 = scmp.lt.s32.totalorder %s2290_s17, %s2290_s17 }
 0x50f   :  { %v2085_v21 = vcombine.high %v2059_v20, %v2067_v46  ;;  %v2101_v25 = vcombine.high %v2075_v22, %v2083_v61  ;;  %v2084_v26 = vcombine.low %v2059_v20, %v2067_v46  ;;  %v2100_v56 = vcombine.low %v2075_v22, %v2083_v61  ;;  %p2584_p1 = scmp.ne.s32.totalorder %s2290_s17, %s2583_s18  ;;  %p2589_p3 = scmp.lt.s32.totalorder %s2583_s18, %s2583_s18 }
 0x510   :  { %v1991_v27 = vrot.slane %v1984_v55, %v2714_v24  ;;  %v1999_v28 = vrot.slane %v2341_v49, %v2714_v24  ;;  %v2007_v57 = vrot.slane %v2000_v54, %v2714_v24  ;;  %v2015_v58 = vrot.slane %v2342_v35, %v2714_v24 }
 0x511   :  { %v2099_v62 = vrot.slane %v2085_v21, %v2733_v34  ;;  %v2115_v29 = vrot.slane %v2101_v25, %v2733_v34  ;;  %v2092_v30 = vrot.slane %v2084_v26, %v2733_v34  ;;  %v2108_v31 = vrot.slane %v2100_v56, %v2733_v34  ;;  %p2590_p4 = por %p2589_p3, %p2588_p2 }
 0x512   :  { %v2016_v32 = vcombine.low %v1991_v27, %v1999_v28  ;;  %v2032_v33 = vcombine.low %v2007_v57, %v2015_v58  ;;  %v2017_v59 = vcombine.high %v1991_v27, %v1999_v28  ;;  %v2033_v38 = vcombine.high %v2007_v57, %v2015_v58 }
 0x513   :  { %v2118_v36 = vcombine.low %v2099_v62, %v2115_v29  ;;  %v2117_v52 = vcombine.high %v2092_v30, %v2108_v31  ;;  %v2116_v37 = vcombine.low %v2092_v30, %v2108_v31  ;;  %v2119_v41 = vcombine.high %v2099_v62, %v2115_v29  ;;  %p2591_p5 = pnand %p2590_p4, %p2584_p1 }
 0x514   :  { %v2024_v24 = vrot.slane %v2016_v32, %v2733_v34  ;;  %v2040_v39 = vrot.slane %v2032_v33, %v2733_v34  ;;  %v2031_v42 = vrot.slane %v2017_v59, %v2733_v34  ;;  %v2047_v43 = vrot.slane %v2033_v38, %v2733_v34 }
 0x515   :  { %2132 = vrot.lane.b32.xlu0 %v2118_v36, %s2622_s13  ;;  %2124 = vrot.lane.b32.xlu1 %v2117_v52, %s2612_s24  ;;  %v2158_v60 = vsub.s32 0, %v2703_v19  ;;  %v2278_v62 = vsub.s32 2, %v2703_v19  ;;  %v2273_v29 = vrot.slane %v2151_v13, %v2272_v6 }
 0x516   :  { %v2048_v7 = vcombine.low %v2024_v24, %v2040_v39  ;;  %v2049_v15 = vcombine.high %v2024_v24, %v2040_v39  ;;  %v2050_v44 = vcombine.low %v2031_v42, %v2047_v43  ;;  %v2051_v45 = vcombine.high %v2031_v42, %v2047_v43 }
 0x517   :  { %v2159_v63 = vrot.slane %v2151_v13, %v2158_v60  ;;  %v2279_v31 = vrot.slane %v2151_v13, %v2278_v62 }
 0x519   :  { %2140 = vrot.lane.b32.xlu1 %v2119_v41, %s2623_s14  ;;  %2122 = vrot.lane.b32.xlu0 %v2049_v15, %s2612_s24 }
 0x51d   :  { %2130 = vrot.lane.b32.xlu0 %v2050_v44, %s2622_s13 }
 0x521   :  { %2138 = vrot.lane.b32.xlu0 %v2051_v45, %s2623_s14 }
 0x587   :  { %v2133_v47 = vpop.permute.xlu0 %2132  ;;  %v2125_v50 = vpop.permute.xlu1 %2124 }
 0x588   :  { %v2145_v8 = vsel %vm1086_vm1, %v2116_v37, %v2125_v50 }
 0x589   :  { %v2147_v10 = vsel %vm1435_vm4, %v2145_v8, %v2133_v47 }
 0x58b   :  { %v2123_v48 = vpop.permute.xlu0 %2122  ;;  %v2141_v53 = vpop.permute.xlu1 %2140 }
 0x58c   :  { %v2144_v16 = vsel %vm1086_vm1, %v2048_v7, %v2123_v48  ;;  %v2150_v12 = vsel %vm2148_vm5, %v2147_v10, %v2141_v53 }
 0x58f   :  { %v2131_v51 = vpop.permute.xlu0 %2130 }
 0x590   :  { %v2146_v34 = vsel %vm1435_vm4, %v2144_v16, %v2131_v51 }
 0x593   :  { %v2139_v11 = vpop.permute.xlu0 %2138 }
 0x594   :  { %v2149_v17 = vsel %vm2148_vm5, %v2146_v34, %v2139_v11 }
 0x595   :  { %2466 = vmatprep.mubr.msk.f32.mxu0 %vm75_vm0, %v2149_v17 }
 0x596   :  { %2467 = vmatmul.mubr.msk.f32.vlgmr.msra.gmra.mxu0 %vm75_vm0, %v2150_v12 }
 0x656   :  { %v2468_v0 = vpop.f32.mrf.mxu0 }
 0x657   :  { %v2238_v1 = vadd.f32 %v2468_v0, %v2159_v63 }
 0x658   :  { %v2232_v2 = vpop.f32.mrf.mxu0 }
 0x659   :  { %v2233_v4 = vadd.f32 %v2232_v2, %v2159_v63  ;;  %v2242_v3 = vadd.f32 %v2521_v5, %v2238_v1 }
 0x65b   :  { %v2246_v9 = vsel %vm75_vm0, %v2242_v3, 0.0  ;;  %v2241_v23 = vadd.f32 %v2522_v14, %v2233_v4 }
 0x65c   :  { %2247 = vadd.xlane.f32.xlu1 %v2246_v9 }
 0x65d   :  { %v2243_v20 = vsel %vm75_vm0, %v2241_v23, 0.0 }
 0x65e   :  { %2244 = vadd.xlane.f32.xlu0 %v2243_v20 }
 0x6e5   :  { %v2248_v46 = vpop.xlane.xlu1 %2247 }
 0x6e6   :  { %v2251_v22 = vmul.f32 0.03125, %v2248_v46 }
 0x6e7   :  { %v2245_v61 = vpop.xlane.xlu0 %2244 }
 0x6e8   :  { %v2250_v55 = vmul.f32 0.03125, %v2245_v61  ;;  %v2253_v49 = vsub.f32 %v2242_v3, %v2251_v22 }
 0x6ea   :  { %v2252_v54 = vsub.f32 %v2241_v23, %v2250_v55  ;;  %v2255_v25 = vmul.f32 %v2253_v49, %v2253_v49 }
 0x6ec   :  { %v2254_v35 = vmul.f32 %v2252_v54, %v2252_v54  ;;  %v2259_v26 = vsel %vm75_vm0, %v2255_v25, 0.0 }
 0x6ee   :  { %v2256_v21 = vsel %vm75_vm0, %v2254_v35, 0.0 }
 0x6ef   :  { %2257 = vadd.xlane.f32.xlu0 %v2256_v21 }
 0x6f3   :  { %2260 = vadd.xlane.f32.xlu0 %v2259_v26 }
 0x778   :  { %v2258_v56 = vpop.xlane.xlu0 %2257 }
 0x779   :  { %v2262_v27 = vmul.f32 0.03125, %v2258_v56 }
 0x77b   :  { %v2264_v28 = vadd.f32 1e-05, %v2262_v27 }
 0x77c   :  { %v2261_v57 = vpop.xlane.xlu0 %2260 }
 0x77d   :  { %2517 = vrsqrt.f32 %v2264_v28  ;;  %v2263_v58 = vmul.f32 0.03125, %v2261_v57 }
 0x77f   :  { %v2265_v18 = vadd.f32 1e-05, %v2263_v58 }
 0x781   :  { %2519 = vrsqrt.f32 %v2265_v18 }
 0x78a   :  { %v2518_v30 = vpop.eup %2517 }
 0x78b   :  { %v2268_v32 = vmul.f32 %v2518_v30, %v2252_v54 }
 0x78d   :  { %v2274_v33 = vmul.f32 %v2273_v29, %v2268_v32 }
 0x78e   :  { %v2520_v59 = vpop.eup %2519 }
 0x78f   :  { %v2269_v36 = vmul.f32 %v2520_v59, %v2253_v49  ;;  %v2280_v52 = vadd.f32 %v2279_v31, %v2274_v33 }
 0x791   :  { %v2275_v37 = vmul.f32 %v2273_v29, %v2269_v36  ;;  %2282 = vst.msk [vmem:[#allocation8] sm:$0xff] %vm75_vm0, %v2280_v52 }
 0x793   :  { %v2281_v38 = vadd.f32 %v2279_v31, %v2275_v37 }
 0x795   :  { %2283 = vst.msk [vmem:[#allocation8 + $0x8] sm:$0xff] %vm75_vm0, %v2281_v38 }
 0x796   :  { %2594 = shalt.err (!%p2591_p5)
}
 0x797   :  { %2295 = dma.vmem_to_hbm [thread:$0]  %s2290_s17, 256, %s3044_s5, [#allocation4], %s2611_s23, %s2611_s23, %s2612_s24  }
 0x798   :  { %2607 = dma.done.wait [#allocation4], 256  }
 0x799   :  { %2608 = vsyncadd [#allocation4], 4294967040 }
 0x79a   :  { %2299 = vsyncpa [#allocation3], 1 }
 0x79b   :  { %2300 = vsyncpa [#allocation6], 1 }
 0x79c   :  { %2301 = vsyncpa [#allocation4], 1 }

</bundles_post_ra>
